<compile_context>
chip_gen: v7x
topology: tpu7x:2x2x1
jax: 0.10.0
libtpu: 0.0.40
codegen_flags: <defaults>
</compile_context>

<pallas_src>
import jax
import jax.numpy as jnp
from jax.experimental import pallas as pl
from jax.experimental.pallas import tpu as pltpu


def simple_rnn_kernel(x_ref, p_ref, out_ref):
    # x_ref:   (T, B)      time-major input scalars, B on the lane axis
    # p_ref:   (H, H + 4)  packed params:
    #            cols 0..H-1 = W_hh (un-transposed, column k = W_hh[:, k])
    #            col  H      = w_ih          (input->hidden weights)
    #            col  H+1    = b_ih + b_hh   (combined bias)
    #            col  H+2    = fc weight
    #            col  H+3    = fc bias in element [0], rest zero padding
    # out_ref: (1, B)      lane-dense output (transposed to (B,1) by wrapper)
    x_tb = x_ref[...]                 # (T, B)
    p = p_ref[...]                    # (H, H+4)

    T, B = x_tb.shape
    H = p.shape[0]

    w_ih = p[:, H:H + 1]              # (H, 1)
    bias = p[:, H + 1:H + 2]          # (H, 1)
    fc_w = p[:, H + 2:H + 3]          # (H, 1)
    fc_b = p[0:1, H + 3:H + 4]        # (1, 1)

    # Hoisted, loop-invariant W_hh column broadcasts: only H distinct
    # slice+broadcast ops total (JAX does not CSE broadcast_in_dim, so these
    # must NOT live inside the unrolled t-loop).
    w_cols = [jnp.broadcast_to(p[:, k:k + 1], (H, B)) for k in range(H)]

    # Hoisted input projection + combined bias, done once outside the
    # recurrence:  xw[t, i, b] = x[t, b] * w_ih[i] + bias[i]
    xw = x_tb[:, None, :] * w_ih[None, :, :] + bias[None, :, :]   # (T, H, B)

    # Fully unrolled recurrence (T, H small & static).  h is (H, B):
    # H exactly fills the 8 f32 sublanes, B rides the 128-lane fast axis.
    # Kept off the MXU: per step, H broadcast-multiply-adds on the VPU
    # (only the sublane broadcast of h[k] remains on the serial chain).
    h = jnp.zeros((H, B), jnp.float32)
    for t in range(T):
        pre = xw[t]                                   # (H, B), static index
        for k in range(H):
            pre = pre + h[k:k + 1, :] * w_cols[k]
        h = jnp.tanh(pre)                             # EUP

    # Final Linear(H, 1): VPU multiply + sublane reduce, lane-dense store.
    out_ref[...] = jnp.sum(h * fc_w, axis=0, keepdims=True) + fc_b   # (1, B)


@jax.jit
def simple_rnn_forward(x, w_ih, w_hh, b_ih, b_hh, fc_w, fc_b):
    """x: (B, T) f32.  Weight shapes follow PyTorch conventions:
       w_ih (H,1), w_hh (H,H), b_ih (H,), b_hh (H,), fc_w (1,H), fc_b (1,)."""
    B, _ = x.shape
    H = w_hh.shape[0]
    # The reshapes below assume input_size == 1 and output_size == 1 (as in
    # the reference module); anything else needs a real transpose.
    assert w_ih.shape == (H, 1) and fc_w.shape[0] == 1

    # Pack every parameter into ONE contiguous (H, H+4) f32 slab -> a single
    # padded-tile DMA instead of five, sliced with static indices in-kernel.
    w_ih_col = w_ih.reshape(H, 1).astype(jnp.float32)
    b_col = (b_ih + b_hh).reshape(H, 1).astype(jnp.float32)
    fc_w_col = fc_w.reshape(H, 1).astype(jnp.float32)
    fc_b_col = jnp.zeros((H, 1), jnp.float32).at[0, 0].set(fc_b[0])
    params = jnp.concatenate(
        [w_hh.astype(jnp.float32), w_ih_col, b_col, fc_w_col, fc_b_col], axis=1
    )                                                        # (H, H+4)

    x_tb = jnp.transpose(x).astype(jnp.float32)              # (T, B) time-major

    vmem = pl.BlockSpec(memory_space=pltpu.MemorySpace.VMEM)
    # TODO(synk): if batch B is ever scaled up, add a ("parallel",) batch grid
    # axis (2x on v7x's second TensorCore) and size the B-tile against v7x's
    # 64 MiB VMEM (32 MiB scoped default) with vmem_limit_bytes set explicitly.
    out_1b = pl.pallas_call(
        simple_rnn_kernel,
        out_shape=jax.ShapeDtypeStruct((1, B), jnp.float32),
        in_specs=[vmem, vmem],
        out_specs=vmem,
    )(x_tb, params)
    # Lane-dense (1, B) store in-kernel; present (B, 1) to the caller (fused
    # into this jit, matches the PyTorch module's output shape).
    return jnp.transpose(out_1b)


def simple_rnn_reference(x, w_ih, w_hh, b_ih, b_hh, fc_w, fc_b):
    """Pure-JAX reference of the PyTorch forward pass."""
    B, T = x.shape
    h = jnp.zeros((B, w_hh.shape[0]), jnp.float32)
    for t in range(T):
        x_t = x[:, t:t + 1]                                    # (B, 1)
        h = jnp.tanh(x_t @ w_ih.T + h @ w_hh.T + b_ih + b_hh)
    return h @ fc_w.T + fc_b


if __name__ == "__main__":
    hidden_size = 8
    output_size = 1
    input_size = 1
    B, T = 2, 8

    key = jax.random.PRNGKey(0)
    k = jax.random.split(key, 8)
    bound = 1.0 / jnp.sqrt(jnp.float32(hidden_size))

    # Deterministic "PyTorch-like" uniform(-1/sqrt(H), 1/sqrt(H)) init.
    w_ih = jax.random.uniform(k[0], (hidden_size, input_size), jnp.float32, -bound, bound)
    w_hh = jax.random.uniform(k[1], (hidden_size, hidden_size), jnp.float32, -bound, bound)
    b_ih = jax.random.uniform(k[2], (hidden_size,), jnp.float32, -bound, bound)
    b_hh = jax.random.uniform(k[3], (hidden_size,), jnp.float32, -bound, bound)
    fc_w = jax.random.uniform(k[4], (output_size, hidden_size), jnp.float32, -bound, bound)
    fc_b = jax.random.uniform(k[5], (output_size,), jnp.float32, -bound, bound)

    x = jax.random.normal(k[6], (B, T), jnp.float32)

    out = simple_rnn_forward(x, w_ih, w_hh, b_ih, b_hh, fc_w, fc_b)
    out = jax.block_until_ready(out)

    ref = simple_rnn_reference(x, w_ih, w_hh, b_ih, b_hh, fc_w, fc_b)
    assert out.shape == (B, 1)
    assert jnp.allclose(out, ref, atol=1e-5, rtol=1e-5)

    print("KERNEL_OK")
</pallas_src>

<mosaic_0001>
module attributes {stable_mosaic.version = 11 : i64} {
  func.func @simple_rnn_kernel(%arg0: memref<8x2xf32, #tpu.memory_space<vmem>>, %arg1: memref<8x12xf32, #tpu.memory_space<vmem>>, %arg2: memref<1x2xf32, #tpu.memory_space<vmem>>) attributes {dimension_semantics = [], scalar_prefetch = 0 : i64, scratch_operands = 0 : i64, tpu.core_type = #tpu.core_type<tc>} {
    %c0 = arith.constant 0 : index
    %c0_0 = arith.constant 0 : index
    %0 = vector.load %arg0[%c0, %c0_0] : memref<8x2xf32, #tpu.memory_space<vmem>>, vector<8x2xf32>
    %c0_1 = arith.constant 0 : index
    %c0_2 = arith.constant 0 : index
    %1 = vector.load %arg1[%c0_1, %c0_2] : memref<8x12xf32, #tpu.memory_space<vmem>>, vector<8x12xf32>
    %2 = vector.extract_strided_slice %1 {offsets = [0, 8], sizes = [8, 1], strides = [1, 1]} : vector<8x12xf32> to vector<8x1xf32>
    %3 = vector.extract_strided_slice %1 {offsets = [0, 9], sizes = [8, 1], strides = [1, 1]} : vector<8x12xf32> to vector<8x1xf32>
    %4 = vector.extract_strided_slice %1 {offsets = [0, 10], sizes = [8, 1], strides = [1, 1]} : vector<8x12xf32> to vector<8x1xf32>
    %5 = vector.extract_strided_slice %1 {offsets = [0, 11], sizes = [1, 1], strides = [1, 1]} : vector<8x12xf32> to vector<1x1xf32>
    %6 = vector.extract_strided_slice %1 {offsets = [0, 0], sizes = [8, 1], strides = [1, 1]} : vector<8x12xf32> to vector<8x1xf32>
    %7 = vector.shape_cast %6 : vector<8x1xf32> to vector<8x1xf32>
    %8 = vector.broadcast %7 : vector<8x1xf32> to vector<8x2xf32>
    %9 = vector.extract_strided_slice %1 {offsets = [0, 1], sizes = [8, 1], strides = [1, 1]} : vector<8x12xf32> to vector<8x1xf32>
    %10 = vector.shape_cast %9 : vector<8x1xf32> to vector<8x1xf32>
    %11 = vector.broadcast %10 : vector<8x1xf32> to vector<8x2xf32>
    %12 = vector.extract_strided_slice %1 {offsets = [0, 2], sizes = [8, 1], strides = [1, 1]} : vector<8x12xf32> to vector<8x1xf32>
    %13 = vector.shape_cast %12 : vector<8x1xf32> to vector<8x1xf32>
    %14 = vector.broadcast %13 : vector<8x1xf32> to vector<8x2xf32>
    %15 = vector.extract_strided_slice %1 {offsets = [0, 3], sizes = [8, 1], strides = [1, 1]} : vector<8x12xf32> to vector<8x1xf32>
    %16 = vector.shape_cast %15 : vector<8x1xf32> to vector<8x1xf32>
    %17 = vector.broadcast %16 : vector<8x1xf32> to vector<8x2xf32>
    %18 = vector.extract_strided_slice %1 {offsets = [0, 4], sizes = [8, 1], strides = [1, 1]} : vector<8x12xf32> to vector<8x1xf32>
    %19 = vector.shape_cast %18 : vector<8x1xf32> to vector<8x1xf32>
    %20 = vector.broadcast %19 : vector<8x1xf32> to vector<8x2xf32>
    %21 = vector.extract_strided_slice %1 {offsets = [0, 5], sizes = [8, 1], strides = [1, 1]} : vector<8x12xf32> to vector<8x1xf32>
    %22 = vector.shape_cast %21 : vector<8x1xf32> to vector<8x1xf32>
    %23 = vector.broadcast %22 : vector<8x1xf32> to vector<8x2xf32>
    %24 = vector.extract_strided_slice %1 {offsets = [0, 6], sizes = [8, 1], strides = [1, 1]} : vector<8x12xf32> to vector<8x1xf32>
    %25 = vector.shape_cast %24 : vector<8x1xf32> to vector<8x1xf32>
    %26 = vector.broadcast %25 : vector<8x1xf32> to vector<8x2xf32>
    %27 = vector.extract_strided_slice %1 {offsets = [0, 7], sizes = [8, 1], strides = [1, 1]} : vector<8x12xf32> to vector<8x1xf32>
    %28 = vector.shape_cast %27 : vector<8x1xf32> to vector<8x1xf32>
    %29 = vector.broadcast %28 : vector<8x1xf32> to vector<8x2xf32>
    %30 = vector.shape_cast %0 : vector<8x2xf32> to vector<8x1x2xf32>
    %31 = vector.shape_cast %2 : vector<8x1xf32> to vector<1x8x1xf32>
    %32 = vector.broadcast %30 : vector<8x1x2xf32> to vector<8x8x2xf32>
    %33 = vector.broadcast %31 : vector<1x8x1xf32> to vector<8x8x2xf32>
    %34 = arith.mulf %32, %33 : vector<8x8x2xf32>
    %35 = vector.shape_cast %3 : vector<8x1xf32> to vector<1x8x1xf32>
    %36 = vector.broadcast %35 : vector<1x8x1xf32> to vector<8x8x2xf32>
    %37 = arith.addf %34, %36 : vector<8x8x2xf32>
    %cst = arith.constant 0.000000e+00 : f32
    %38 = vector.broadcast %cst : f32 to vector<8x2xf32>
    %39 = vector.extract_strided_slice %37 {offsets = [0, 0, 0], sizes = [1, 8, 2], strides = [1, 1, 1]} : vector<8x8x2xf32> to vector<1x8x2xf32>
    %40 = vector.shape_cast %39 : vector<1x8x2xf32> to vector<8x2xf32>
    %41 = vector.extract_strided_slice %38 {offsets = [0, 0], sizes = [1, 2], strides = [1, 1]} : vector<8x2xf32> to vector<1x2xf32>
    %42 = vector.broadcast %41 : vector<1x2xf32> to vector<8x2xf32>
    %43 = arith.mulf %42, %8 : vector<8x2xf32>
    %44 = arith.addf %40, %43 : vector<8x2xf32>
    %45 = vector.extract_strided_slice %38 {offsets = [1, 0], sizes = [1, 2], strides = [1, 1]} : vector<8x2xf32> to vector<1x2xf32>
    %46 = vector.broadcast %45 : vector<1x2xf32> to vector<8x2xf32>
    %47 = arith.mulf %46, %11 : vector<8x2xf32>
    %48 = arith.addf %44, %47 : vector<8x2xf32>
    %49 = vector.extract_strided_slice %38 {offsets = [2, 0], sizes = [1, 2], strides = [1, 1]} : vector<8x2xf32> to vector<1x2xf32>
    %50 = vector.broadcast %49 : vector<1x2xf32> to vector<8x2xf32>
    %51 = arith.mulf %50, %14 : vector<8x2xf32>
    %52 = arith.addf %48, %51 : vector<8x2xf32>
    %53 = vector.extract_strided_slice %38 {offsets = [3, 0], sizes = [1, 2], strides = [1, 1]} : vector<8x2xf32> to vector<1x2xf32>
    %54 = vector.broadcast %53 : vector<1x2xf32> to vector<8x2xf32>
    %55 = arith.mulf %54, %17 : vector<8x2xf32>
    %56 = arith.addf %52, %55 : vector<8x2xf32>
    %57 = vector.extract_strided_slice %38 {offsets = [4, 0], sizes = [1, 2], strides = [1, 1]} : vector<8x2xf32> to vector<1x2xf32>
    %58 = vector.broadcast %57 : vector<1x2xf32> to vector<8x2xf32>
    %59 = arith.mulf %58, %20 : vector<8x2xf32>
    %60 = arith.addf %56, %59 : vector<8x2xf32>
    %61 = vector.extract_strided_slice %38 {offsets = [5, 0], sizes = [1, 2], strides = [1, 1]} : vector<8x2xf32> to vector<1x2xf32>
    %62 = vector.broadcast %61 : vector<1x2xf32> to vector<8x2xf32>
    %63 = arith.mulf %62, %23 : vector<8x2xf32>
    %64 = arith.addf %60, %63 : vector<8x2xf32>
    %65 = vector.extract_strided_slice %38 {offsets = [6, 0], sizes = [1, 2], strides = [1, 1]} : vector<8x2xf32> to vector<1x2xf32>
    %66 = vector.broadcast %65 : vector<1x2xf32> to vector<8x2xf32>
    %67 = arith.mulf %66, %26 : vector<8x2xf32>
    %68 = arith.addf %64, %67 : vector<8x2xf32>
    %69 = vector.extract_strided_slice %38 {offsets = [7, 0], sizes = [1, 2], strides = [1, 1]} : vector<8x2xf32> to vector<1x2xf32>
    %70 = vector.broadcast %69 : vector<1x2xf32> to vector<8x2xf32>
    %71 = arith.mulf %70, %29 : vector<8x2xf32>
    %72 = arith.addf %68, %71 : vector<8x2xf32>
    %73 = math.tanh %72 : vector<8x2xf32>
    %74 = vector.extract_strided_slice %37 {offsets = [1, 0, 0], sizes = [1, 8, 2], strides = [1, 1, 1]} : vector<8x8x2xf32> to vector<1x8x2xf32>
    %75 = vector.shape_cast %74 : vector<1x8x2xf32> to vector<8x2xf32>
    %76 = vector.extract_strided_slice %73 {offsets = [0, 0], sizes = [1, 2], strides = [1, 1]} : vector<8x2xf32> to vector<1x2xf32>
    %77 = vector.broadcast %76 : vector<1x2xf32> to vector<8x2xf32>
    %78 = arith.mulf %77, %8 : vector<8x2xf32>
    %79 = arith.addf %75, %78 : vector<8x2xf32>
    %80 = vector.extract_strided_slice %73 {offsets = [1, 0], sizes = [1, 2], strides = [1, 1]} : vector<8x2xf32> to vector<1x2xf32>
    %81 = vector.broadcast %80 : vector<1x2xf32> to vector<8x2xf32>
    %82 = arith.mulf %81, %11 : vector<8x2xf32>
    %83 = arith.addf %79, %82 : vector<8x2xf32>
    %84 = vector.extract_strided_slice %73 {offsets = [2, 0], sizes = [1, 2], strides = [1, 1]} : vector<8x2xf32> to vector<1x2xf32>
    %85 = vector.broadcast %84 : vector<1x2xf32> to vector<8x2xf32>
    %86 = arith.mulf %85, %14 : vector<8x2xf32>
    %87 = arith.addf %83, %86 : vector<8x2xf32>
    %88 = vector.extract_strided_slice %73 {offsets = [3, 0], sizes = [1, 2], strides = [1, 1]} : vector<8x2xf32> to vector<1x2xf32>
    %89 = vector.broadcast %88 : vector<1x2xf32> to vector<8x2xf32>
    %90 = arith.mulf %89, %17 : vector<8x2xf32>
    %91 = arith.addf %87, %90 : vector<8x2xf32>
    %92 = vector.extract_strided_slice %73 {offsets = [4, 0], sizes = [1, 2], strides = [1, 1]} : vector<8x2xf32> to vector<1x2xf32>
    %93 = vector.broadcast %92 : vector<1x2xf32> to vector<8x2xf32>
    %94 = arith.mulf %93, %20 : vector<8x2xf32>
    %95 = arith.addf %91, %94 : vector<8x2xf32>
    %96 = vector.extract_strided_slice %73 {offsets = [5, 0], sizes = [1, 2], strides = [1, 1]} : vector<8x2xf32> to vector<1x2xf32>
    %97 = vector.broadcast %96 : vector<1x2xf32> to vector<8x2xf32>
    %98 = arith.mulf %97, %23 : vector<8x2xf32>
    %99 = arith.addf %95, %98 : vector<8x2xf32>
    %100 = vector.extract_strided_slice %73 {offsets = [6, 0], sizes = [1, 2], strides = [1, 1]} : vector<8x2xf32> to vector<1x2xf32>
    %101 = vector.broadcast %100 : vector<1x2xf32> to vector<8x2xf32>
    %102 = arith.mulf %101, %26 : vector<8x2xf32>
    %103 = arith.addf %99, %102 : vector<8x2xf32>
    %104 = vector.extract_strided_slice %73 {offsets = [7, 0], sizes = [1, 2], strides = [1, 1]} : vector<8x2xf32> to vector<1x2xf32>
    %105 = vector.broadcast %104 : vector<1x2xf32> to vector<8x2xf32>
    %106 = arith.mulf %105, %29 : vector<8x2xf32>
    %107 = arith.addf %103, %106 : vector<8x2xf32>
    %108 = math.tanh %107 : vector<8x2xf32>
    %109 = vector.extract_strided_slice %37 {offsets = [2, 0, 0], sizes = [1, 8, 2], strides = [1, 1, 1]} : vector<8x8x2xf32> to vector<1x8x2xf32>
    %110 = vector.shape_cast %109 : vector<1x8x2xf32> to vector<8x2xf32>
    %111 = vector.extract_strided_slice %108 {offsets = [0, 0], sizes = [1, 2], strides = [1, 1]} : vector<8x2xf32> to vector<1x2xf32>
    %112 = vector.broadcast %111 : vector<1x2xf32> to vector<8x2xf32>
    %113 = arith.mulf %112, %8 : vector<8x2xf32>
    %114 = arith.addf %110, %113 : vector<8x2xf32>
    %115 = vector.extract_strided_slice %108 {offsets = [1, 0], sizes = [1, 2], strides = [1, 1]} : vector<8x2xf32> to vector<1x2xf32>
    %116 = vector.broadcast %115 : vector<1x2xf32> to vector<8x2xf32>
    %117 = arith.mulf %116, %11 : vector<8x2xf32>
    %118 = arith.addf %114, %117 : vector<8x2xf32>
    %119 = vector.extract_strided_slice %108 {offsets = [2, 0], sizes = [1, 2], strides = [1, 1]} : vector<8x2xf32> to vector<1x2xf32>
    %120 = vector.broadcast %119 : vector<1x2xf32> to vector<8x2xf32>
    %121 = arith.mulf %120, %14 : vector<8x2xf32>
    %122 = arith.addf %118, %121 : vector<8x2xf32>
    %123 = vector.extract_strided_slice %108 {offsets = [3, 0], sizes = [1, 2], strides = [1, 1]} : vector<8x2xf32> to vector<1x2xf32>
    %124 = vector.broadcast %123 : vector<1x2xf32> to vector<8x2xf32>
    %125 = arith.mulf %124, %17 : vector<8x2xf32>
    %126 = arith.addf %122, %125 : vector<8x2xf32>
    %127 = vector.extract_strided_slice %108 {offsets = [4, 0], sizes = [1, 2], strides = [1, 1]} : vector<8x2xf32> to vector<1x2xf32>
    %128 = vector.broadcast %127 : vector<1x2xf32> to vector<8x2xf32>
    %129 = arith.mulf %128, %20 : vector<8x2xf32>
    %130 = arith.addf %126, %129 : vector<8x2xf32>
    %131 = vector.extract_strided_slice %108 {offsets = [5, 0], sizes = [1, 2], strides = [1, 1]} : vector<8x2xf32> to vector<1x2xf32>
    %132 = vector.broadcast %131 : vector<1x2xf32> to vector<8x2xf32>
    %133 = arith.mulf %132, %23 : vector<8x2xf32>
    %134 = arith.addf %130, %133 : vector<8x2xf32>
    %135 = vector.extract_strided_slice %108 {offsets = [6, 0], sizes = [1, 2], strides = [1, 1]} : vector<8x2xf32> to vector<1x2xf32>
    %136 = vector.broadcast %135 : vector<1x2xf32> to vector<8x2xf32>
    %137 = arith.mulf %136, %26 : vector<8x2xf32>
    %138 = arith.addf %134, %137 : vector<8x2xf32>
    %139 = vector.extract_strided_slice %108 {offsets = [7, 0], sizes = [1, 2], strides = [1, 1]} : vector<8x2xf32> to vector<1x2xf32>
    %140 = vector.broadcast %139 : vector<1x2xf32> to vector<8x2xf32>
    %141 = arith.mulf %140, %29 : vector<8x2xf32>
    %142 = arith.addf %138, %141 : vector<8x2xf32>
    %143 = math.tanh %142 : vector<8x2xf32>
    %144 = vector.extract_strided_slice %37 {offsets = [3, 0, 0], sizes = [1, 8, 2], strides = [1, 1, 1]} : vector<8x8x2xf32> to vector<1x8x2xf32>
    %145 = vector.shape_cast %144 : vector<1x8x2xf32> to vector<8x2xf32>
    %146 = vector.extract_strided_slice %143 {offsets = [0, 0], sizes = [1, 2], strides = [1, 1]} : vector<8x2xf32> to vector<1x2xf32>
    %147 = vector.broadcast %146 : vector<1x2xf32> to vector<8x2xf32>
    %148 = arith.mulf %147, %8 : vector<8x2xf32>
    %149 = arith.addf %145, %148 : vector<8x2xf32>
    %150 = vector.extract_strided_slice %143 {offsets = [1, 0], sizes = [1, 2], strides = [1, 1]} : vector<8x2xf32> to vector<1x2xf32>
    %151 = vector.broadcast %150 : vector<1x2xf32> to vector<8x2xf32>
    %152 = arith.mulf %151, %11 : vector<8x2xf32>
    %153 = arith.addf %149, %152 : vector<8x2xf32>
    %154 = vector.extract_strided_slice %143 {offsets = [2, 0], sizes = [1, 2], strides = [1, 1]} : vector<8x2xf32> to vector<1x2xf32>
    %155 = vector.broadcast %154 : vector<1x2xf32> to vector<8x2xf32>
    %156 = arith.mulf %155, %14 : vector<8x2xf32>
    %157 = arith.addf %153, %156 : vector<8x2xf32>
    %158 = vector.extract_strided_slice %143 {offsets = [3, 0], sizes = [1, 2], strides = [1, 1]} : vector<8x2xf32> to vector<1x2xf32>
    %159 = vector.broadcast %158 : vector<1x2xf32> to vector<8x2xf32>
    %160 = arith.mulf %159, %17 : vector<8x2xf32>
    %161 = arith.addf %157, %160 : vector<8x2xf32>
    %162 = vector.extract_strided_slice %143 {offsets = [4, 0], sizes = [1, 2], strides = [1, 1]} : vector<8x2xf32> to vector<1x2xf32>
    %163 = vector.broadcast %162 : vector<1x2xf32> to vector<8x2xf32>
    %164 = arith.mulf %163, %20 : vector<8x2xf32>
    %165 = arith.addf %161, %164 : vector<8x2xf32>
    %166 = vector.extract_strided_slice %143 {offsets = [5, 0], sizes = [1, 2], strides = [1, 1]} : vector<8x2xf32> to vector<1x2xf32>
    %167 = vector.broadcast %166 : vector<1x2xf32> to vector<8x2xf32>
    %168 = arith.mulf %167, %23 : vector<8x2xf32>
    %169 = arith.addf %165, %168 : vector<8x2xf32>
    %170 = vector.extract_strided_slice %143 {offsets = [6, 0], sizes = [1, 2], strides = [1, 1]} : vector<8x2xf32> to vector<1x2xf32>
    %171 = vector.broadcast %170 : vector<1x2xf32> to vector<8x2xf32>
    %172 = arith.mulf %171, %26 : vector<8x2xf32>
    %173 = arith.addf %169, %172 : vector<8x2xf32>
    %174 = vector.extract_strided_slice %143 {offsets = [7, 0], sizes = [1, 2], strides = [1, 1]} : vector<8x2xf32> to vector<1x2xf32>
    %175 = vector.broadcast %174 : vector<1x2xf32> to vector<8x2xf32>
    %176 = arith.mulf %175, %29 : vector<8x2xf32>
    %177 = arith.addf %173, %176 : vector<8x2xf32>
    %178 = math.tanh %177 : vector<8x2xf32>
    %179 = vector.extract_strided_slice %37 {offsets = [4, 0, 0], sizes = [1, 8, 2], strides = [1, 1, 1]} : vector<8x8x2xf32> to vector<1x8x2xf32>
    %180 = vector.shape_cast %179 : vector<1x8x2xf32> to vector<8x2xf32>
    %181 = vector.extract_strided_slice %178 {offsets = [0, 0], sizes = [1, 2], strides = [1, 1]} : vector<8x2xf32> to vector<1x2xf32>
    %182 = vector.broadcast %181 : vector<1x2xf32> to vector<8x2xf32>
    %183 = arith.mulf %182, %8 : vector<8x2xf32>
    %184 = arith.addf %180, %183 : vector<8x2xf32>
    %185 = vector.extract_strided_slice %178 {offsets = [1, 0], sizes = [1, 2], strides = [1, 1]} : vector<8x2xf32> to vector<1x2xf32>
    %186 = vector.broadcast %185 : vector<1x2xf32> to vector<8x2xf32>
    %187 = arith.mulf %186, %11 : vector<8x2xf32>
    %188 = arith.addf %184, %187 : vector<8x2xf32>
    %189 = vector.extract_strided_slice %178 {offsets = [2, 0], sizes = [1, 2], strides = [1, 1]} : vector<8x2xf32> to vector<1x2xf32>
    %190 = vector.broadcast %189 : vector<1x2xf32> to vector<8x2xf32>
    %191 = arith.mulf %190, %14 : vector<8x2xf32>
    %192 = arith.addf %188, %191 : vector<8x2xf32>
    %193 = vector.extract_strided_slice %178 {offsets = [3, 0], sizes = [1, 2], strides = [1, 1]} : vector<8x2xf32> to vector<1x2xf32>
    %194 = vector.broadcast %193 : vector<1x2xf32> to vector<8x2xf32>
    %195 = arith.mulf %194, %17 : vector<8x2xf32>
    %196 = arith.addf %192, %195 : vector<8x2xf32>
    %197 = vector.extract_strided_slice %178 {offsets = [4, 0], sizes = [1, 2], strides = [1, 1]} : vector<8x2xf32> to vector<1x2xf32>
    %198 = vector.broadcast %197 : vector<1x2xf32> to vector<8x2xf32>
    %199 = arith.mulf %198, %20 : vector<8x2xf32>
    %200 = arith.addf %196, %199 : vector<8x2xf32>
    %201 = vector.extract_strided_slice %178 {offsets = [5, 0], sizes = [1, 2], strides = [1, 1]} : vector<8x2xf32> to vector<1x2xf32>
    %202 = vector.broadcast %201 : vector<1x2xf32> to vector<8x2xf32>
    %203 = arith.mulf %202, %23 : vector<8x2xf32>
    %204 = arith.addf %200, %203 : vector<8x2xf32>
    %205 = vector.extract_strided_slice %178 {offsets = [6, 0], sizes = [1, 2], strides = [1, 1]} : vector<8x2xf32> to vector<1x2xf32>
    %206 = vector.broadcast %205 : vector<1x2xf32> to vector<8x2xf32>
    %207 = arith.mulf %206, %26 : vector<8x2xf32>
    %208 = arith.addf %204, %207 : vector<8x2xf32>
    %209 = vector.extract_strided_slice %178 {offsets = [7, 0], sizes = [1, 2], strides = [1, 1]} : vector<8x2xf32> to vector<1x2xf32>
    %210 = vector.broadcast %209 : vector<1x2xf32> to vector<8x2xf32>
    %211 = arith.mulf %210, %29 : vector<8x2xf32>
    %212 = arith.addf %208, %211 : vector<8x2xf32>
    %213 = math.tanh %212 : vector<8x2xf32>
    %214 = vector.extract_strided_slice %37 {offsets = [5, 0, 0], sizes = [1, 8, 2], strides = [1, 1, 1]} : vector<8x8x2xf32> to vector<1x8x2xf32>
    %215 = vector.shape_cast %214 : vector<1x8x2xf32> to vector<8x2xf32>
    %216 = vector.extract_strided_slice %213 {offsets = [0, 0], sizes = [1, 2], strides = [1, 1]} : vector<8x2xf32> to vector<1x2xf32>
    %217 = vector.broadcast %216 : vector<1x2xf32> to vector<8x2xf32>
    %218 = arith.mulf %217, %8 : vector<8x2xf32>
    %219 = arith.addf %215, %218 : vector<8x2xf32>
    %220 = vector.extract_strided_slice %213 {offsets = [1, 0], sizes = [1, 2], strides = [1, 1]} : vector<8x2xf32> to vector<1x2xf32>
    %221 = vector.broadcast %220 : vector<1x2xf32> to vector<8x2xf32>
    %222 = arith.mulf %221, %11 : vector<8x2xf32>
    %223 = arith.addf %219, %222 : vector<8x2xf32>
    %224 = vector.extract_strided_slice %213 {offsets = [2, 0], sizes = [1, 2], strides = [1, 1]} : vector<8x2xf32> to vector<1x2xf32>
    %225 = vector.broadcast %224 : vector<1x2xf32> to vector<8x2xf32>
    %226 = arith.mulf %225, %14 : vector<8x2xf32>
    %227 = arith.addf %223, %226 : vector<8x2xf32>
    %228 = vector.extract_strided_slice %213 {offsets = [3, 0], sizes = [1, 2], strides = [1, 1]} : vector<8x2xf32> to vector<1x2xf32>
    %229 = vector.broadcast %228 : vector<1x2xf32> to vector<8x2xf32>
    %230 = arith.mulf %229, %17 : vector<8x2xf32>
    %231 = arith.addf %227, %230 : vector<8x2xf32>
    %232 = vector.extract_strided_slice %213 {offsets = [4, 0], sizes = [1, 2], strides = [1, 1]} : vector<8x2xf32> to vector<1x2xf32>
    %233 = vector.broadcast %232 : vector<1x2xf32> to vector<8x2xf32>
    %234 = arith.mulf %233, %20 : vector<8x2xf32>
    %235 = arith.addf %231, %234 : vector<8x2xf32>
    %236 = vector.extract_strided_slice %213 {offsets = [5, 0], sizes = [1, 2], strides = [1, 1]} : vector<8x2xf32> to vector<1x2xf32>
    %237 = vector.broadcast %236 : vector<1x2xf32> to vector<8x2xf32>
    %238 = arith.mulf %237, %23 : vector<8x2xf32>
    %239 = arith.addf %235, %238 : vector<8x2xf32>
    %240 = vector.extract_strided_slice %213 {offsets = [6, 0], sizes = [1, 2], strides = [1, 1]} : vector<8x2xf32> to vector<1x2xf32>
    %241 = vector.broadcast %240 : vector<1x2xf32> to vector<8x2xf32>
    %242 = arith.mulf %241, %26 : vector<8x2xf32>
    %243 = arith.addf %239, %242 : vector<8x2xf32>
    %244 = vector.extract_strided_slice %213 {offsets = [7, 0], sizes = [1, 2], strides = [1, 1]} : vector<8x2xf32> to vector<1x2xf32>
    %245 = vector.broadcast %244 : vector<1x2xf32> to vector<8x2xf32>
    %246 = arith.mulf %245, %29 : vector<8x2xf32>
    %247 = arith.addf %243, %246 : vector<8x2xf32>
    %248 = math.tanh %247 : vector<8x2xf32>
    %249 = vector.extract_strided_slice %37 {offsets = [6, 0, 0], sizes = [1, 8, 2], strides = [1, 1, 1]} : vector<8x8x2xf32> to vector<1x8x2xf32>
    %250 = vector.shape_cast %249 : vector<1x8x2xf32> to vector<8x2xf32>
    %251 = vector.extract_strided_slice %248 {offsets = [0, 0], sizes = [1, 2], strides = [1, 1]} : vector<8x2xf32> to vector<1x2xf32>
    %252 = vector.broadcast %251 : vector<1x2xf32> to vector<8x2xf32>
    %253 = arith.mulf %252, %8 : vector<8x2xf32>
    %254 = arith.addf %250, %253 : vector<8x2xf32>
    %255 = vector.extract_strided_slice %248 {offsets = [1, 0], sizes = [1, 2], strides = [1, 1]} : vector<8x2xf32> to vector<1x2xf32>
    %256 = vector.broadcast %255 : vector<1x2xf32> to vector<8x2xf32>
    %257 = arith.mulf %256, %11 : vector<8x2xf32>
    %258 = arith.addf %254, %257 : vector<8x2xf32>
    %259 = vector.extract_strided_slice %248 {offsets = [2, 0], sizes = [1, 2], strides = [1, 1]} : vector<8x2xf32> to vector<1x2xf32>
    %260 = vector.broadcast %259 : vector<1x2xf32> to vector<8x2xf32>
    %261 = arith.mulf %260, %14 : vector<8x2xf32>
    %262 = arith.addf %258, %261 : vector<8x2xf32>
    %263 = vector.extract_strided_slice %248 {offsets = [3, 0], sizes = [1, 2], strides = [1, 1]} : vector<8x2xf32> to vector<1x2xf32>
    %264 = vector.broadcast %263 : vector<1x2xf32> to vector<8x2xf32>
    %265 = arith.mulf %264, %17 : vector<8x2xf32>
    %266 = arith.addf %262, %265 : vector<8x2xf32>
    %267 = vector.extract_strided_slice %248 {offsets = [4, 0], sizes = [1, 2], strides = [1, 1]} : vector<8x2xf32> to vector<1x2xf32>
    %268 = vector.broadcast %267 : vector<1x2xf32> to vector<8x2xf32>
    %269 = arith.mulf %268, %20 : vector<8x2xf32>
    %270 = arith.addf %266, %269 : vector<8x2xf32>
    %271 = vector.extract_strided_slice %248 {offsets = [5, 0], sizes = [1, 2], strides = [1, 1]} : vector<8x2xf32> to vector<1x2xf32>
    %272 = vector.broadcast %271 : vector<1x2xf32> to vector<8x2xf32>
    %273 = arith.mulf %272, %23 : vector<8x2xf32>
    %274 = arith.addf %270, %273 : vector<8x2xf32>
    %275 = vector.extract_strided_slice %248 {offsets = [6, 0], sizes = [1, 2], strides = [1, 1]} : vector<8x2xf32> to vector<1x2xf32>
    %276 = vector.broadcast %275 : vector<1x2xf32> to vector<8x2xf32>
    %277 = arith.mulf %276, %26 : vector<8x2xf32>
    %278 = arith.addf %274, %277 : vector<8x2xf32>
    %279 = vector.extract_strided_slice %248 {offsets = [7, 0], sizes = [1, 2], strides = [1, 1]} : vector<8x2xf32> to vector<1x2xf32>
    %280 = vector.broadcast %279 : vector<1x2xf32> to vector<8x2xf32>
    %281 = arith.mulf %280, %29 : vector<8x2xf32>
    %282 = arith.addf %278, %281 : vector<8x2xf32>
    %283 = math.tanh %282 : vector<8x2xf32>
    %284 = vector.extract_strided_slice %37 {offsets = [7, 0, 0], sizes = [1, 8, 2], strides = [1, 1, 1]} : vector<8x8x2xf32> to vector<1x8x2xf32>
    %285 = vector.shape_cast %284 : vector<1x8x2xf32> to vector<8x2xf32>
    %286 = vector.extract_strided_slice %283 {offsets = [0, 0], sizes = [1, 2], strides = [1, 1]} : vector<8x2xf32> to vector<1x2xf32>
    %287 = vector.broadcast %286 : vector<1x2xf32> to vector<8x2xf32>
    %288 = arith.mulf %287, %8 : vector<8x2xf32>
    %289 = arith.addf %285, %288 : vector<8x2xf32>
    %290 = vector.extract_strided_slice %283 {offsets = [1, 0], sizes = [1, 2], strides = [1, 1]} : vector<8x2xf32> to vector<1x2xf32>
    %291 = vector.broadcast %290 : vector<1x2xf32> to vector<8x2xf32>
    %292 = arith.mulf %291, %11 : vector<8x2xf32>
    %293 = arith.addf %289, %292 : vector<8x2xf32>
    %294 = vector.extract_strided_slice %283 {offsets = [2, 0], sizes = [1, 2], strides = [1, 1]} : vector<8x2xf32> to vector<1x2xf32>
    %295 = vector.broadcast %294 : vector<1x2xf32> to vector<8x2xf32>
    %296 = arith.mulf %295, %14 : vector<8x2xf32>
    %297 = arith.addf %293, %296 : vector<8x2xf32>
    %298 = vector.extract_strided_slice %283 {offsets = [3, 0], sizes = [1, 2], strides = [1, 1]} : vector<8x2xf32> to vector<1x2xf32>
    %299 = vector.broadcast %298 : vector<1x2xf32> to vector<8x2xf32>
    %300 = arith.mulf %299, %17 : vector<8x2xf32>
    %301 = arith.addf %297, %300 : vector<8x2xf32>
    %302 = vector.extract_strided_slice %283 {offsets = [4, 0], sizes = [1, 2], strides = [1, 1]} : vector<8x2xf32> to vector<1x2xf32>
    %303 = vector.broadcast %302 : vector<1x2xf32> to vector<8x2xf32>
    %304 = arith.mulf %303, %20 : vector<8x2xf32>
    %305 = arith.addf %301, %304 : vector<8x2xf32>
    %306 = vector.extract_strided_slice %283 {offsets = [5, 0], sizes = [1, 2], strides = [1, 1]} : vector<8x2xf32> to vector<1x2xf32>
    %307 = vector.broadcast %306 : vector<1x2xf32> to vector<8x2xf32>
    %308 = arith.mulf %307, %23 : vector<8x2xf32>
    %309 = arith.addf %305, %308 : vector<8x2xf32>
    %310 = vector.extract_strided_slice %283 {offsets = [6, 0], sizes = [1, 2], strides = [1, 1]} : vector<8x2xf32> to vector<1x2xf32>
    %311 = vector.broadcast %310 : vector<1x2xf32> to vector<8x2xf32>
    %312 = arith.mulf %311, %26 : vector<8x2xf32>
    %313 = arith.addf %309, %312 : vector<8x2xf32>
    %314 = vector.extract_strided_slice %283 {offsets = [7, 0], sizes = [1, 2], strides = [1, 1]} : vector<8x2xf32> to vector<1x2xf32>
    %315 = vector.broadcast %314 : vector<1x2xf32> to vector<8x2xf32>
    %316 = arith.mulf %315, %29 : vector<8x2xf32>
    %317 = arith.addf %313, %316 : vector<8x2xf32>
    %318 = math.tanh %317 : vector<8x2xf32>
    %319 = vector.broadcast %4 : vector<8x1xf32> to vector<8x2xf32>
    %320 = arith.mulf %318, %319 : vector<8x2xf32>
    %cst_3 = arith.constant dense<0.000000e+00> : vector<2xf32>
    %321 = vector.multi_reduction <add>, %320, %cst_3 [0] : vector<8x2xf32> to vector<2xf32>
    %322 = vector.shape_cast %321 : vector<2xf32> to vector<1x2xf32>
    %323 = vector.broadcast %5 : vector<1x1xf32> to vector<1x2xf32>
    %324 = arith.addf %322, %323 : vector<1x2xf32>
    %c0_4 = arith.constant 0 : index
    %c0_5 = arith.constant 0 : index
    %325 = vector.load %arg2[%c0_4, %c0_5] : memref<1x2xf32, #tpu.memory_space<vmem>>, vector<1x2xf32>
    tpu.vector_store %arg2[%c0_4, %c0_5], %324 {strides = array<i32>} : memref<1x2xf32, #tpu.memory_space<vmem>>, vector<1x2xf32>,
    return
  }
}

</mosaic_0001>

<bundles_post_ra>
// kernel: simple_rnn_forward.1
= control target key start
LH: loop header
LB: loop body
LE: loop exit
PB: predicated region body
PF: predicated region fallthrough
CT: control target
= control target key end

     0   :  { %v622_v1 = vmov 9   ;;  %v623_v2 = vmov 8   ;;  %s877_s0 = inlined_call_operand.vmem [shape: f32[8,2], index: 0, kind: input, shape index: {}]   ;;  %s878_s1 = inlined_call_operand.vmem [shape: f32[8,12], index: 1, kind: input, shape index: {}]   ;;  %s879_s2 = inlined_call_operand.hbm [shape: f32[1,2], index: 2, kind: output, shape index: {}]  }
   0x1   :  { %v654_v0 = vld [vmem:[%s878_s1] sm:$0xff]  ;;  %571 = vset.pattern.permute.xlu1 %v622_v1  ;;  %569 = vset.pattern.permute.xlu0 %v623_v2 }
   0x2   :  { %7 = vsyncpa [#allocation3], 0  ;;  %150 = vperm.xlu1 %571, %v654_v0   ;;  %138 = vperm.xlu0 %569, %v654_v0   ;;  %v52_v3 = vlaneseq  ;;  %v12_v4 = vld [vmem:[%s877_s0] sm:$0xff]  ;;  %v624_v5 = vmov 1966171168   ;;  %v625_v10 = vmov 1  }
   0x3   :  { %v50_v6 = vunpack.c.l.s4 %v624_v5  ;;  %v48_v9 = vcombine.high %v12_v4, %v12_v4  ;;  %v626_v11 = vmov 0   ;;  %v627_v14 = vmov 2   ;;  %s635_s0 = smov [#allocation2]  }
   0x4   :  { %v661_v7 = vshrl.u32 %v52_v3, 7  ;;  %v628_v15 = vmov 3   ;;  %v629_v19 = vmov 4   ;;  %v630_v20 = vmov 6   ;;  %s547_s1 = sshll.u32 %s635_s0, 4  ;;  %s548_s1 = int_to_ptr.vmem [resolvable:$true] %s547_s1 }
   0x5   :  { %v51_v8 = vunpack.c.0.s8 %v50_v6  ;;  %v631_v21 = vmov 5   ;;  %v632_v22 = vmov 7   ;;  %v633_v58 = vmov 10   ;;  %s598_s13 = scalar_lea.vmem %s548_s1, 16  ;;  %s602_s14 = scalar_lea.vmem %s548_s1, 32 }
   0x6   :  { %572 = vset.pattern.permute.xlu1 %v625_v10  ;;  %570 = vset.pattern.permute.xlu0 %v626_v11  ;;  %v675_v27 = vsub.s32 0, %v661_v7  ;;  %vm526_vm0 = vcmask 15360   ;;  %vm539_vm1 = vcmask 8192   ;;  %p599_p0 = scmp.ne.s32.totalorder %s548_s1, %s598_s13  ;;  %p603_p1 = scmp.lt.s32.totalorder %s548_s1, %s548_s1 }
   0x7   :  { %20 = vperm.xlu1 %572, %v654_v0   ;;  %16 = vperm.xlu0 %570, %v654_v0   ;;  %v54_v12 = vsub.s32 %v51_v8, %v661_v7  ;;  %v634_v8 = vmov 11   ;;  %p604_p2 = scmp.lt.s32.totalorder %s602_s14, %s598_s13 }
   0x9   :  { %v62_v13 = vrot.slane %v48_v9, %v54_v12  ;;  %v55_v23 = vrot.slane %v12_v4, %v54_v12  ;;  %p605_p3 = por %p604_p2, %p603_p1 }
   0xb   :  { %573 = vset.pattern.permute.xlu1 %v627_v14  ;;  %574 = vset.pattern.permute.xlu0 %v628_v15  ;;  %v64_v16 = vcombine.high %v62_v13, %v62_v13  ;;  %v78_v17 = vrot.slane %v62_v13, %v54_v12  ;;  %v63_v24 = vcombine.high %v55_v23, %v55_v23  ;;  %p606_p4 = pnand %p605_p3, %p599_p0 }
   0xc   :  { %24 = vperm.xlu1 %573, %v654_v0   ;;  %28 = vperm.xlu0 %574, %v654_v0   ;;  %v71_v25 = vrot.slane %v55_v23, %v54_v12  ;;  %v733_v23 = vsub.s32 3, %v661_v7 }
   0xd   :  { %v92_v18 = vrot.slane %v64_v16, %v54_v12  ;;  %v672_v26 = vrot.slane %v63_v24, %v54_v12  ;;  %v94_v30 = vcombine.high %v78_v17, %v78_v17  ;;  %v116_v35 = vrot.slane %v78_v17, %v675_v27 }
   0xe   :  { %v93_v28 = vcombine.high %v71_v25, %v71_v25  ;;  %v100_v32 = vrot.slane %v71_v25, %v675_v27 }
   0xf   :  { %v95_v29 = vcombine.high %v672_v26, %v672_v26  ;;  %v96_v31 = vcombine.high %v92_v18, %v92_v18  ;;  %v120_v36 = vrot.slane %v92_v18, %v675_v27  ;;  %v124_v37 = vrot.slane %v94_v30, %v675_v27 }
  0x10   :  { %575 = vset.pattern.permute.xlu1 %v629_v19  ;;  %577 = vset.pattern.permute.xlu0 %v630_v20  ;;  %v108_v33 = vrot.slane %v93_v28, %v675_v27  ;;  %v104_v19 = vrot.slane %v672_v26, %v675_v27 }
  0x11   :  { %32 = vperm.xlu1 %575, %v654_v0   ;;  %40 = vperm.xlu0 %577, %v654_v0   ;;  %v112_v34 = vrot.slane %v95_v29, %v675_v27  ;;  %v128_v38 = vrot.slane %v96_v31, %v675_v27  ;;  %v738_v29 = vsub.s32 4, %v661_v7  ;;  %v743_v31 = vsub.s32 5, %v661_v7 }
  0x15   :  { %576 = vset.pattern.permute.xlu1 %v631_v21  ;;  %580 = vset.pattern.permute.xlu0 %v634_v8  ;;  %v730_v21 = vsub.s32 2, %v661_v7 }
  0x16   :  { %36 = vperm.xlu1 %576, %v654_v0   ;;  %535 = vperm.xlu0 %580, %v654_v0  }
  0x1a   :  { %578 = vset.pattern.permute.xlu1 %v632_v22 }
  0x1b   :  { %44 = vperm.xlu1 %578, %v654_v0  }
  0x1f   :  { %579 = vset.pattern.permute.xlu1 %v633_v58 }
  0x20   :  { %522 = vperm.xlu1 %579, %v654_v0   ;;  %v727_v0 = vsub.s32 1, %v661_v7 }
  0x81   :  { %v151_v39 = vpop.permute.xlu1 %150  ;;  %v139_v40 = vpop.permute.xlu0 %138 }
  0x82   :  { %v141_v41 = vmul.f32 %v139_v40, %v100_v32  ;;  %v143_v42 = vmul.f32 %v139_v40, %v108_v33  ;;  %v144_v43 = vmul.f32 %v139_v40, %v112_v34  ;;  %v145_v44 = vmul.f32 %v139_v40, %v116_v35 }
  0x83   :  { %v146_v45 = vmul.f32 %v139_v40, %v120_v36  ;;  %v147_v46 = vmul.f32 %v139_v40, %v124_v37  ;;  %v148_v47 = vmul.f32 %v139_v40, %v128_v38  ;;  %v142_v20 = vmul.f32 %v139_v40, %v104_v19 }
  0x84   :  { %v686_v48 = vadd.f32 %v151_v39, %v143_v42  ;;  %v688_v49 = vadd.f32 %v151_v39, %v144_v43  ;;  %v690_v50 = vadd.f32 %v151_v39, %v145_v44  ;;  %v153_v56 = vadd.f32 %v151_v39, %v141_v41 }
  0x85   :  { %v692_v51 = vadd.f32 %v151_v39, %v146_v45  ;;  %v694_v52 = vadd.f32 %v151_v39, %v147_v46  ;;  %v696_v53 = vadd.f32 %v151_v39, %v148_v47  ;;  %v154_v28 = vadd.f32 %v151_v39, %v142_v20 }
  0x86   :  { %v698_v54 = vpop.permute.xlu1 %20  ;;  %v700_v55 = vpop.permute.xlu0 %16  ;;  %v748_v35 = vsub.s32 6, %v661_v7  ;;  %v753_v39 = vsub.s32 7, %v661_v7 }
  0x87   :  { %v161_v57 = vmul.f32 0.0, %v700_v55  ;;  %v163_v59 = vmul.f32 0.0, %v698_v54 }
  0x89   :  { %v162_v60 = vadd.f32 %v161_v57, %v153_v56 }
  0x8b   :  { %v705_v61 = vpop.permute.xlu1 %24  ;;  %v164_v62 = vadd.f32 %v163_v59, %v162_v60  ;;  %v707_v63 = vpop.permute.xlu0 %28 }
  0x8c   :  { %v165_v1 = vmul.f32 0.0, %v705_v61  ;;  %v167_v3 = vmul.f32 0.0, %v707_v63 }
  0x8e   :  { %v166_v2 = vadd.f32 %v165_v1, %v164_v62 }
  0x90   :  { %v711_v4 = vpop.permute.xlu1 %32  ;;  %v168_v5 = vadd.f32 %v167_v3, %v166_v2  ;;  %v714_v9 = vpop.permute.xlu0 %40 }
  0x91   :  { %v169_v6 = vmul.f32 0.0, %v711_v4  ;;  %v173_v13 = vmul.f32 0.0, %v714_v9 }
  0x93   :  { %v170_v11 = vadd.f32 %v169_v6, %v168_v5 }
  0x95   :  { %v717_v10 = vpop.permute.xlu1 %36 }
  0x96   :  { %v171_v12 = vmul.f32 0.0, %v717_v10 }
  0x98   :  { %v172_v14 = vadd.f32 %v171_v12, %v170_v11 }
  0x9a   :  { %v174_v15 = vadd.f32 %v173_v13, %v172_v14  ;;  %v721_v16 = vpop.permute.xlu1 %44 }
  0x9b   :  { %v175_v17 = vmul.f32 0.0, %v721_v16 }
  0x9d   :  { %v176_v18 = vadd.f32 %v175_v17, %v174_v15 }
  0x9f   :  { %582 = vtanh.f32 %v176_v18 }
  0xa9   :  { %v583_v22 = vpop.eup %582 }
  0xaa   :  { %v181_v24 = vrot.slane %v583_v22, %v675_v27  ;;  %v187_v25 = vrot.slane %v583_v22, %v727_v0  ;;  %v193_v30 = vrot.slane %v583_v22, %v730_v21  ;;  %v199_v34 = vrot.slane %v583_v22, %v733_v23 }
  0xab   :  { %v205_v38 = vrot.slane %v583_v22, %v738_v29  ;;  %v211_v42 = vrot.slane %v583_v22, %v743_v31  ;;  %v217_v45 = vrot.slane %v583_v22, %v748_v35  ;;  %v223_v56 = vrot.slane %v583_v22, %v753_v39 }
  0xac   :  { %v182_v26 = vmul.f32 %v181_v24, %v700_v55  ;;  %v188_v33 = vmul.f32 %v187_v25, %v698_v54  ;;  %v194_v37 = vmul.f32 %v193_v30, %v705_v61  ;;  %v200_v41 = vmul.f32 %v199_v34, %v707_v63 }
  0xad   :  { %v206_v44 = vmul.f32 %v205_v38, %v711_v4  ;;  %v212_v47 = vmul.f32 %v211_v42, %v717_v10  ;;  %v218_v58 = vmul.f32 %v217_v45, %v714_v9  ;;  %v224_v59 = vmul.f32 %v223_v56, %v721_v16 }
  0xae   :  { %v183_v32 = vadd.f32 %v182_v26, %v154_v28 }
  0xb0   :  { %v189_v36 = vadd.f32 %v188_v33, %v183_v32 }
  0xb2   :  { %v195_v40 = vadd.f32 %v194_v37, %v189_v36 }
  0xb4   :  { %v201_v43 = vadd.f32 %v200_v41, %v195_v40 }
  0xb6   :  { %v207_v46 = vadd.f32 %v206_v44, %v201_v43 }
  0xb8   :  { %v213_v57 = vadd.f32 %v212_v47, %v207_v46 }
  0xba   :  { %v219_v7 = vadd.f32 %v218_v58, %v213_v57 }
  0xbc   :  { %v225_v60 = vadd.f32 %v224_v59, %v219_v7 }
  0xbe   :  { %584 = vtanh.f32 %v225_v60 }
  0xc8   :  { %v585_v62 = vpop.eup %584 }
  0xc9   :  { %v230_v1 = vrot.slane %v585_v62, %v675_v27  ;;  %v236_v2 = vrot.slane %v585_v62, %v727_v0  ;;  %v242_v5 = vrot.slane %v585_v62, %v730_v21  ;;  %v248_v11 = vrot.slane %v585_v62, %v733_v23 }
  0xca   :  { %v254_v14 = vrot.slane %v585_v62, %v738_v29  ;;  %v260_v18 = vrot.slane %v585_v62, %v743_v31  ;;  %v266_v22 = vrot.slane %v585_v62, %v748_v35  ;;  %v272_v25 = vrot.slane %v585_v62, %v753_v39 }
  0xcb   :  { %v231_v3 = vmul.f32 %v230_v1, %v700_v55  ;;  %v237_v8 = vmul.f32 %v236_v2, %v698_v54  ;;  %v243_v13 = vmul.f32 %v242_v5, %v705_v61  ;;  %v249_v17 = vmul.f32 %v248_v11, %v707_v63 }
  0xcc   :  { %v255_v20 = vmul.f32 %v254_v14, %v711_v4  ;;  %v261_v24 = vmul.f32 %v260_v18, %v717_v10  ;;  %v267_v26 = vmul.f32 %v266_v22, %v714_v9  ;;  %v273_v32 = vmul.f32 %v272_v25, %v721_v16 }
  0xcd   :  { %v232_v6 = vadd.f32 %v231_v3, %v686_v48 }
  0xcf   :  { %v238_v12 = vadd.f32 %v237_v8, %v232_v6 }
  0xd1   :  { %v244_v15 = vadd.f32 %v243_v13, %v238_v12 }
  0xd3   :  { %v250_v19 = vadd.f32 %v249_v17, %v244_v15 }
  0xd5   :  { %v256_v48 = vadd.f32 %v255_v20, %v250_v19 }
  0xd7   :  { %v262_v28 = vadd.f32 %v261_v24, %v256_v48 }
  0xd9   :  { %v268_v30 = vadd.f32 %v267_v26, %v262_v28 }
  0xdb   :  { %v274_v33 = vadd.f32 %v273_v32, %v268_v30 }
  0xdd   :  { %586 = vtanh.f32 %v274_v33 }
  0xe7   :  { %v587_v34 = vpop.eup %586 }
  0xe8   :  { %v279_v36 = vrot.slane %v587_v34, %v675_v27  ;;  %v285_v37 = vrot.slane %v587_v34, %v727_v0  ;;  %v291_v40 = vrot.slane %v587_v34, %v730_v21  ;;  %v297_v43 = vrot.slane %v587_v34, %v733_v23 }
  0xe9   :  { %v303_v46 = vrot.slane %v587_v34, %v738_v29  ;;  %v309_v57 = vrot.slane %v587_v34, %v743_v31  ;;  %v315_v59 = vrot.slane %v587_v34, %v748_v35  ;;  %v321_v62 = vrot.slane %v587_v34, %v753_v39 }
  0xea   :  { %v280_v38 = vmul.f32 %v279_v36, %v700_v55  ;;  %v286_v42 = vmul.f32 %v285_v37, %v698_v54  ;;  %v292_v45 = vmul.f32 %v291_v40, %v705_v61  ;;  %v298_v56 = vmul.f32 %v297_v43, %v707_v63 }
  0xeb   :  { %v304_v7 = vmul.f32 %v303_v46, %v711_v4  ;;  %v310_v60 = vmul.f32 %v309_v57, %v717_v10  ;;  %v316_v2 = vmul.f32 %v315_v59, %v714_v9  ;;  %v322_v5 = vmul.f32 %v321_v62, %v721_v16 }
  0xec   :  { %v281_v41 = vadd.f32 %v280_v38, %v688_v49 }
  0xee   :  { %v287_v44 = vadd.f32 %v286_v42, %v281_v41 }
  0xf0   :  { %v293_v47 = vadd.f32 %v292_v45, %v287_v44 }
  0xf2   :  { %v299_v58 = vadd.f32 %v298_v56, %v293_v47 }
  0xf4   :  { %v305_v49 = vadd.f32 %v304_v7, %v299_v58 }
  0xf6   :  { %v311_v1 = vadd.f32 %v310_v60, %v305_v49 }
  0xf8   :  { %v317_v3 = vadd.f32 %v316_v2, %v311_v1 }
  0xfa   :  { %v323_v6 = vadd.f32 %v322_v5, %v317_v3 }
  0xfc   :  { %588 = vtanh.f32 %v323_v6 }
 0x106   :  { %v589_v8 = vpop.eup %588 }
 0x107   :  { %v328_v11 = vrot.slane %v589_v8, %v675_v27  ;;  %v334_v12 = vrot.slane %v589_v8, %v727_v0  ;;  %v340_v14 = vrot.slane %v589_v8, %v730_v21  ;;  %v346_v18 = vrot.slane %v589_v8, %v733_v23 }
 0x108   :  { %v352_v22 = vrot.slane %v589_v8, %v738_v29  ;;  %v358_v25 = vrot.slane %v589_v8, %v743_v31  ;;  %v364_v30 = vrot.slane %v589_v8, %v748_v35  ;;  %v370_v33 = vrot.slane %v589_v8, %v753_v39 }
 0x109   :  { %v329_v13 = vmul.f32 %v328_v11, %v700_v55  ;;  %v335_v17 = vmul.f32 %v334_v12, %v698_v54  ;;  %v341_v20 = vmul.f32 %v340_v14, %v705_v61  ;;  %v347_v24 = vmul.f32 %v346_v18, %v707_v63 }
 0x10a   :  { %v353_v26 = vmul.f32 %v352_v22, %v711_v4  ;;  %v359_v32 = vmul.f32 %v358_v25, %v717_v10  ;;  %v365_v36 = vmul.f32 %v364_v30, %v714_v9  ;;  %v371_v38 = vmul.f32 %v370_v33, %v721_v16 }
 0x10b   :  { %v330_v15 = vadd.f32 %v329_v13, %v690_v50 }
 0x10d   :  { %v336_v19 = vadd.f32 %v335_v17, %v330_v15 }
 0x10f   :  { %v342_v48 = vadd.f32 %v341_v20, %v336_v19 }
 0x111   :  { %v348_v28 = vadd.f32 %v347_v24, %v342_v48 }
 0x113   :  { %v354_v50 = vadd.f32 %v353_v26, %v348_v28 }
 0x115   :  { %v360_v34 = vadd.f32 %v359_v32, %v354_v50 }
 0x117   :  { %v366_v37 = vadd.f32 %v365_v36, %v360_v34 }
 0x119   :  { %v372_v40 = vadd.f32 %v371_v38, %v366_v37 }
 0x11b   :  { %590 = vtanh.f32 %v372_v40 }
 0x125   :  { %v591_v41 = vpop.eup %590 }
 0x126   :  { %v377_v42 = vrot.slane %v591_v41, %v675_v27  ;;  %v383_v43 = vrot.slane %v591_v41, %v727_v0  ;;  %v389_v45 = vrot.slane %v591_v41, %v730_v21  ;;  %v395_v56 = vrot.slane %v591_v41, %v733_v23 }
 0x127   :  { %v401_v7 = vrot.slane %v591_v41, %v738_v29  ;;  %v407_v60 = vrot.slane %v591_v41, %v743_v31  ;;  %v413_v2 = vrot.slane %v591_v41, %v748_v35  ;;  %v419_v5 = vrot.slane %v591_v41, %v753_v39 }
 0x128   :  { %v378_v44 = vmul.f32 %v377_v42, %v700_v55  ;;  %v384_v47 = vmul.f32 %v383_v43, %v698_v54  ;;  %v390_v58 = vmul.f32 %v389_v45, %v705_v61  ;;  %v396_v49 = vmul.f32 %v395_v56, %v707_v63 }
 0x129   :  { %v402_v1 = vmul.f32 %v401_v7, %v711_v4  ;;  %v408_v3 = vmul.f32 %v407_v60, %v717_v10  ;;  %v414_v8 = vmul.f32 %v413_v2, %v714_v9  ;;  %v420_v12 = vmul.f32 %v419_v5, %v721_v16 }
 0x12a   :  { %v379_v46 = vadd.f32 %v378_v44, %v692_v51 }
 0x12c   :  { %v385_v57 = vadd.f32 %v384_v47, %v379_v46 }
 0x12e   :  { %v391_v59 = vadd.f32 %v390_v58, %v385_v57 }
 0x130   :  { %v397_v62 = vadd.f32 %v396_v49, %v391_v59 }
 0x132   :  { %v403_v51 = vadd.f32 %v402_v1, %v397_v62 }
 0x134   :  { %v409_v6 = vadd.f32 %v408_v3, %v403_v51 }
 0x136   :  { %v415_v11 = vadd.f32 %v414_v8, %v409_v6 }
 0x138   :  { %v421_v13 = vadd.f32 %v420_v12, %v415_v11  ;;  %v536_v12 = vpop.permute.xlu0 %535 }
 0x13a   :  { %592 = vtanh.f32 %v421_v13 }
 0x144   :  { %v593_v14 = vpop.eup %592 }
 0x145   :  { %v426_v15 = vrot.slane %v593_v14, %v675_v27  ;;  %v432_v17 = vrot.slane %v593_v14, %v727_v0  ;;  %v438_v19 = vrot.slane %v593_v14, %v730_v21  ;;  %v444_v48 = vrot.slane %v593_v14, %v733_v23 }
 0x146   :  { %v450_v28 = vrot.slane %v593_v14, %v738_v29  ;;  %v456_v50 = vrot.slane %v593_v14, %v743_v31  ;;  %v462_v34 = vrot.slane %v593_v14, %v748_v35  ;;  %v468_v37 = vrot.slane %v593_v14, %v753_v39 }
 0x147   :  { %v427_v18 = vmul.f32 %v426_v15, %v700_v55  ;;  %v433_v22 = vmul.f32 %v432_v17, %v698_v54  ;;  %v439_v25 = vmul.f32 %v438_v19, %v705_v61  ;;  %v445_v30 = vmul.f32 %v444_v48, %v707_v63 }
 0x148   :  { %v451_v33 = vmul.f32 %v450_v28, %v711_v4  ;;  %v457_v36 = vmul.f32 %v456_v50, %v717_v10  ;;  %v463_v40 = vmul.f32 %v462_v34, %v714_v9  ;;  %v469_v42 = vmul.f32 %v468_v37, %v721_v16 }
 0x149   :  { %v428_v20 = vadd.f32 %v427_v18, %v694_v52 }
 0x14b   :  { %v434_v24 = vadd.f32 %v433_v22, %v428_v20 }
 0x14d   :  { %v440_v26 = vadd.f32 %v439_v25, %v434_v24 }
 0x14f   :  { %v446_v32 = vadd.f32 %v445_v30, %v440_v26 }
 0x151   :  { %v452_v52 = vadd.f32 %v451_v33, %v446_v32 }
 0x153   :  { %v458_v38 = vadd.f32 %v457_v36, %v452_v52 }
 0x155   :  { %v464_v41 = vadd.f32 %v463_v40, %v458_v38 }
 0x157   :  { %v470_v43 = vadd.f32 %v469_v42, %v464_v41 }
 0x159   :  { %594 = vtanh.f32 %v470_v43 }
 0x163   :  { %v595_v44 = vpop.eup %594 }
 0x164   :  { %v475_v45 = vrot.slane %v595_v44, %v675_v27  ;;  %v481_v46 = vrot.slane %v595_v44, %v727_v0  ;;  %v487_v56 = vrot.slane %v595_v44, %v730_v21  ;;  %v493_v7 = vrot.slane %v595_v44, %v733_v23 }
 0x165   :  { %v499_v60 = vrot.slane %v595_v44, %v738_v29  ;;  %v505_v0 = vrot.slane %v595_v44, %v743_v31  ;;  %v511_v21 = vrot.slane %v595_v44, %v748_v35  ;;  %v517_v23 = vrot.slane %v595_v44, %v753_v39 }
 0x166   :  { %v476_v47 = vmul.f32 %v475_v45, %v700_v55  ;;  %v482_v58 = vmul.f32 %v481_v46, %v698_v54  ;;  %v488_v49 = vmul.f32 %v487_v56, %v705_v61  ;;  %v494_v27 = vmul.f32 %v493_v7, %v707_v63  ;;  %v523_v63 = vpop.permute.xlu1 %522 }
 0x167   :  { %v500_v55 = vmul.f32 %v499_v60, %v711_v4  ;;  %v506_v54 = vmul.f32 %v505_v0, %v717_v10  ;;  %v512_v61 = vmul.f32 %v511_v21, %v714_v9  ;;  %v518_v29 = vmul.f32 %v517_v23, %v721_v16 }
 0x168   :  { %v477_v57 = vadd.f32 %v476_v47, %v696_v53 }
 0x16a   :  { %v483_v59 = vadd.f32 %v482_v58, %v477_v57 }
 0x16c   :  { %v489_v62 = vadd.f32 %v488_v49, %v483_v59 }
 0x16e   :  { %v495_v1 = vadd.f32 %v494_v27, %v489_v62 }
 0x170   :  { %v501_v53 = vadd.f32 %v500_v55, %v495_v1 }
 0x172   :  { %v507_v2 = vadd.f32 %v506_v54, %v501_v53 }
 0x174   :  { %v513_v51 = vadd.f32 %v512_v61, %v507_v2 }
 0x176   :  { %v519_v3 = vadd.f32 %v518_v29, %v513_v51 }
 0x178   :  { %596 = vtanh.f32 %v519_v3 }
 0x182   :  { %v597_v31 = vpop.eup %596 }
 0x183   :  { %v525_v5 = vmul.f32 %v597_v31, %v523_v63 }
 0x185   :  { %v527_v4 = vsel %vm526_vm0, %v525_v5, 0.0 }
 0x186   :  { %v528_v6 = vrot.slane %v527_v4, 4 }
 0x188   :  { %v529_v35 = vadd.f32 %v528_v6, %v527_v4 }
 0x18a   :  { %v530_v8 = vrot.slane %v529_v35, 2 }
 0x18c   :  { %v531_v11 = vadd.f32 %v530_v8, %v529_v35 }
 0x18e   :  { %v532_v10 = vrot.slane %v531_v11, 1 }
 0x190   :  { %v533_v39 = vadd.f32 %v532_v10, %v531_v11 }
 0x192   :  { %v538_v9 = vadd.f32 %v536_v12, %v533_v39 }
 0x194   :  { %540 = vst.msk [vmem:[#allocation2] sm:$0x1] %vm539_vm1, %v538_v9 }
 0x195   :  { %609 = shalt.err (!%p606_p4)
}
 0x196   :  { %s610_s17 = scalar_lea.hbm %s879_s2, 16 }
 0x197   :  { %p611_p5 = scmp.ne.s32.totalorder %s879_s2, %s610_s17  ;;  %p614_p6 = scmp.lt.u32.totalorder %s610_s17, %s879_s2 }
 0x199   :  { %p616_p7 = pnand %p614_p6, %p611_p5 }
 0x19b   :  { %619 = shalt.err (!%p616_p7)
}
 0x19c   :  { %550 = dma.vmem_to_hbm [thread:$0]  %s548_s1, 16, %s879_s2, [#allocation3]  }
 0x19d   :  { %620 = dma.done.wait [#allocation3], 16  }
 0x19e   :  { %621 = vsyncadd [#allocation3], 4294967280 }
 0x19f   :  { %554 = vsyncpa [#allocation3], 1 }

</bundles_post_ra>
